<compile_context>
chip_gen: v7x
topology: tpu7x:2x2x1
jax: 0.10.0
libtpu: 0.0.40
codegen_flags: <defaults>
</compile_context>

<pallas_src>
import functools

import jax
import jax.numpy as jnp
import numpy as np
from jax.experimental import pallas as pl
from jax.experimental.pallas import tpu as pltpu


# ------------------------------------------------------------------
# Parameter setup (glue, plain numpy): sinusoidal positional encoding
# pe[pos, i] = sin(pos / 10000^{(i//2)*2/embed}) for even i,
#              cos(pos / 10000^{(i//2)*2/embed}) for odd  i.
# ------------------------------------------------------------------
def make_positional_encoding(embed: int, pad_size: int) -> np.ndarray:
    pe = np.array(
        [
            [pos / (10000.0 ** ((i // 2) * 2.0 / embed)) for i in range(embed)]
            for pos in range(pad_size)
        ],
        dtype=np.float32,
    )
    pe[:, 0::2] = np.sin(pe[:, 0::2])
    pe[:, 1::2] = np.cos(pe[:, 1::2])
    return pe


# ------------------------------------------------------------------
# Kernels (operate on lane-dense 2-D [rows, cols] tiles)
# ------------------------------------------------------------------
def _pe_add_kernel(x_ref, pe_ref, o_ref):
    # x_ref: (TB, TC); pe_ref: (1, TC) -> rank-matched sublane-broadcast add.
    o_ref[...] = x_ref[...] + pe_ref[...]


def _pe_add_dropout_kernel(seed_ref, x_ref, pe_ref, o_ref, *,
                           keep_threshold, inv_keep):
    # Training-mode inverted dropout via the TPU hardware PRNG.
    out = x_ref[...] + pe_ref[...]
    # Per-block seed so the streams stay independent under a 2-D grid.
    step = pl.program_id(0) * pl.num_programs(1) + pl.program_id(1)
    pltpu.prng_seed(seed_ref[0] + step)
    bits = pltpu.prng_random_bits(out.shape)
    if bits.dtype != jnp.uint32:  # trace-time check; normally a no-op
        bits = pltpu.bitcast(bits, jnp.uint32)
    keep = bits < jnp.uint32(keep_threshold)  # integer-threshold compare (no f32 convert)
    o_ref[...] = jnp.where(keep, out * inv_keep, jnp.zeros_like(out))


# ------------------------------------------------------------------
# Tiling helpers
# ------------------------------------------------------------------
def _round_up(n: int, m: int) -> int:
    return ((n + m - 1) // m) * m


def _largest_aligned_divisor(total: int, unit: int, max_val: int) -> int:
    """Largest d with d % unit == 0, d | total, d <= max_val (total % unit == 0)."""
    best = unit
    d = unit
    limit = min(total, max_val)
    while d <= limit:
        if total % d == 0:
            best = d
        d += unit
    return best


def _target_block_bytes() -> int:
    """Per-generation block-byte budget (keeps double-buffered tiles in scoped VMEM)."""
    try:
        kind = jax.devices()[0].device_kind.lower()
    except Exception:
        kind = ""
    # v5e and older: 16 MiB scoped-VMEM default -> ~2 MiB blocks (already ~85% roofline).
    if any(g in kind for g in ("v2", "v3", "v4", "v5")):
        return 2 << 20
    # v6e / v7x: 32 MiB scoped default; bigger blocks amortize the ~0.35 us/step overhead.
    return 4 << 20


def _plan_layout(B: int, Wp: int, itemsize: int, target_bytes: int):
    """Pick (Bp, TB, TC) for a [B, Wp] array; Wp is already a multiple of 128."""
    # Whole array fits one comfortable block -> single grid step.
    if B * Wp * itemsize <= target_bytes:
        return B, B, Wp

    # Columns: largest 128-multiple divisor of Wp keeping an 8-row block under budget.
    max_tc = max(128, (target_bytes // max(1, 8 * itemsize)) // 128 * 128)
    TC = _largest_aligned_divisor(Wp, 128, max_tc)

    # Rows: full-batch extent if it fits (always a legal block dim), else a
    # sublane-multiple tile of a sublane-padded batch (never a giant fallback).
    if B <= 8 or B * TC * itemsize <= target_bytes:
        return B, B, TC
    Bp = _round_up(B, 8)
    max_tb = max(8, (target_bytes // (TC * itemsize)) // 8 * 8)
    TB = _largest_aligned_divisor(Bp, 8, max_tb)
    return Bp, TB, TC


# ------------------------------------------------------------------
# Wrapper
# ------------------------------------------------------------------
def positional_encoding(x, pe, *, dropout_rate=0.1, training=False, seed=0):
    """x: [B, S, E], pe: [S, E] -> [B, S, E] (same dtype as x)."""
    B, S, E = x.shape
    assert pe.shape == (S, E)
    dtype = x.dtype
    itemsize = jnp.dtype(dtype).itemsize
    W = S * E

    # Lane-dense layout: fold (S, E) into one streaming axis and pad it to a
    # multiple of 128 so every store is an unmasked full-lane vst.
    Wp = _round_up(W, 128)
    x2 = x.reshape(B, W)
    # NOTE: pe is cast to x.dtype; PyTorch keeps an f32 pe buffer (identical
    # for the f32 case exercised here, slightly different for bf16 callers).
    pe2 = pe.astype(dtype).reshape(1, W)
    if Wp != W:
        x2 = jnp.pad(x2, ((0, 0), (0, Wp - W)))
        pe2 = jnp.pad(pe2, ((0, 0), (0, Wp - W)))

    target = _target_block_bytes()
    Bp, TB, TC = _plan_layout(B, Wp, itemsize, target)
    if Bp != B:
        x2 = jnp.pad(x2, ((0, Bp - B), (0, 0)))

    # Grid: (columns, batch) with batch innermost so pe's block index (0, c) is
    # constant across consecutive steps -> Pallas skips re-DMA of pe.
    grid = (Wp // TC, Bp // TB)
    out_shape = jax.ShapeDtypeStruct((Bp, Wp), dtype)
    # Columns are megacore-parallel; batch stays "arbitrary" so pe-block reuse
    # across the inner loop is guaranteed on each core.
    cparams = pltpu.CompilerParams(dimension_semantics=("parallel", "arbitrary"))

    if not training or dropout_rate == 0.0:
        out = pl.pallas_call(
            _pe_add_kernel,
            out_shape=out_shape,
            grid_spec=pltpu.PrefetchScalarGridSpec(
                num_scalar_prefetch=0,
                grid=grid,
                in_specs=[
                    pl.BlockSpec((TB, TC), lambda c, b: (b, c)),
                    pl.BlockSpec((1, TC), lambda c, b: (0, c)),  # constant over inner axis
                ],
                out_specs=pl.BlockSpec((TB, TC), lambda c, b: (b, c)),
            ),
            compiler_params=cparams,
            # TODO(synk): if callers donate x, add input_output_aliases={0: 0}
            # so the output reuses x's HBM buffer (saves a B*W allocation).
        )(x2, pe2)
    else:
        # Training path: dropout in-kernel with the hardware PRNG.
        keep_prob = 1.0 - float(dropout_rate)
        keep_threshold = min(int(round(keep_prob * float(1 << 32))), (1 << 32) - 1)
        kernel = functools.partial(
            _pe_add_dropout_kernel,
            keep_threshold=keep_threshold,
            inv_keep=1.0 / keep_prob,
        )
        seeds = jnp.asarray([seed], dtype=jnp.int32)
        out = pl.pallas_call(
            kernel,
            out_shape=out_shape,
            grid_spec=pltpu.PrefetchScalarGridSpec(
                num_scalar_prefetch=1,
                grid=grid,
                # index_maps receive the prefetched scalar ref as a trailing arg.
                in_specs=[
                    pl.BlockSpec((TB, TC), lambda c, b, seed_ref: (b, c)),
                    pl.BlockSpec((1, TC), lambda c, b, seed_ref: (0, c)),
                ],
                out_specs=pl.BlockSpec((TB, TC), lambda c, b, seed_ref: (b, c)),
            ),
            compiler_params=cparams,
        )(seeds, x2, pe2)
        # TODO(synk): dropout mask stream differs bit-for-bit from torch.nn.Dropout
        # (same Bernoulli(keep_prob) distribution and 1/keep_prob scaling).

    if Bp != B or Wp != W:
        out = out[:B, :W]
    return out.reshape(B, S, E)


# ------------------------------------------------------------------
# Main
# ------------------------------------------------------------------
if __name__ == "__main__":
    batch, pad_size, embed = 2, 8, 32
    dropout = 0.1  # module hyperparameter; identity in eval mode

    key = jax.random.PRNGKey(0)
    x = jax.random.normal(key, (batch, pad_size, embed), dtype=jnp.float32)

    pe_np = make_positional_encoding(embed, pad_size)
    pe = jnp.asarray(pe_np)

    # Eval-mode forward (dropout is identity), hot path in the Pallas kernel.
    out = positional_encoding(x, pe, dropout_rate=dropout, training=False)
    out = jax.block_until_ready(out)

    # Reference check against plain JAX broadcast add.
    ref = x + pe[None, :, :]
    np.testing.assert_allclose(np.asarray(out), np.asarray(ref), rtol=1e-6, atol=1e-6)

    print("KERNEL_OK")
</pallas_src>

<mosaic_0001>
module attributes {stable_mosaic.version = 11 : i64} {
  func.func @_pe_add_kernel(%arg0: i32, %arg1: i32, %arg2: memref<2x256xf32, #tpu.memory_space<vmem>>, %arg3: memref<1x256xf32, #tpu.memory_space<vmem>>, %arg4: memref<2x256xf32, #tpu.memory_space<vmem>>) attributes {dimension_semantics = [#tpu.dimension_semantics<parallel>, #tpu.dimension_semantics<arbitrary>], iteration_bounds = array<i64: 1, 1>, scalar_prefetch = 0 : i64, scratch_operands = 0 : i64, tpu.core_type = #tpu.core_type<tc>, window_params = [{transform_indices = @transform_0, window_bounds = array<i64: 2, 256>}, {transform_indices = @transform_1, window_bounds = array<i64: 1, 256>}, {transform_indices = @transform_2, window_bounds = array<i64: 2, 256>}]} {
    %c0 = arith.constant 0 : index
    %c0_0 = arith.constant 0 : index
    %0 = vector.load %arg2[%c0, %c0_0] : memref<2x256xf32, #tpu.memory_space<vmem>>, vector<2x256xf32>
    %c0_1 = arith.constant 0 : index
    %c0_2 = arith.constant 0 : index
    %1 = vector.load %arg3[%c0_1, %c0_2] : memref<1x256xf32, #tpu.memory_space<vmem>>, vector<1x256xf32>
    %2 = vector.broadcast %1 : vector<1x256xf32> to vector<2x256xf32>
    %3 = arith.addf %0, %2 : vector<2x256xf32>
    %c0_3 = arith.constant 0 : index
    %c0_4 = arith.constant 0 : index
    %4 = vector.load %arg4[%c0_3, %c0_4] : memref<2x256xf32, #tpu.memory_space<vmem>>, vector<2x256xf32>
    tpu.vector_store %arg4[%c0_3, %c0_4], %3 {strides = array<i32>} : memref<2x256xf32, #tpu.memory_space<vmem>>, vector<2x256xf32>,
    return
  }
  func.func @transform_0(%arg0: i32, %arg1: i32) -> (i32, i32) {
    %c0_i32 = arith.constant 0 : i32
    return %arg1, %arg0 : i32, i32
  }
  func.func @transform_1(%arg0: i32, %arg1: i32) -> (i32, i32) {
    %c0_i32 = arith.constant 0 : i32
    %c0_i32_0 = arith.constant 0 : i32
    return %c0_i32, %arg0 : i32, i32
  }
  func.func @transform_2(%arg0: i32, %arg1: i32) -> (i32, i32) {
    %c0_i32 = arith.constant 0 : i32
    return %arg1, %arg0 : i32, i32
  }
}

</mosaic_0001>

<bundles_post_ra>
// kernel: tpu_custom_call.1
= control target key start
LH: loop header
LB: loop body
LE: loop exit
PB: predicated region body
PF: predicated region fallthrough
CT: control target
= control target key end

     0   :  { %7 = vsyncpa [#allocation3], 0  ;;  %s157_s0 = inlined_call_operand.hbm [shape: f32[2,256], index: 0, kind: input, shape index: {}]   ;;  %s158_s1 = inlined_call_operand.vmem [shape: f32[1,256], index: 1, kind: input, shape index: {}]   ;;  %s159_s2 = inlined_call_operand.hbm [shape: f32[2,256], index: 2, kind: output, shape index: {}]  }
   0x1   :  { %8 = vsyncpa [#allocation4], 0  ;;  %s112_s9 = smov [#allocation2]   ;;  %s64_s13 = scalar_lea.hbm %s157_s0, 64 }
   0x2   :  { %s15_s10 = sshll.u32 %s112_s9, 4  ;;  %p65_p0 = scmp.ne.s32.totalorder %s157_s0, %s64_s13  ;;  %s16_s10 = int_to_ptr.vmem [resolvable:$true] %s15_s10 }
   0x3   :  { %p68_p1 = scmp.lt.u32.totalorder %s64_s13, %s157_s0 }
   0x5   :  { %p70_p2 = pnand %p68_p1, %p65_p0 }
   0x7   :  { %73 = shalt.err (!%p70_p2)
}
   0x8   :  { %s74_s18 = scalar_lea.vmem %s16_s10, 64  ;;  %p79_p4 = scmp.lt.s32.totalorder %s16_s10, %s16_s10 }
   0x9   :  { %p75_p3 = scmp.ne.s32.totalorder %s16_s10, %s74_s18  ;;  %p80_p5 = scmp.lt.s32.totalorder %s74_s18, %s74_s18 }
   0xb   :  { %p81_p6 = por %p80_p5, %p79_p4 }
   0xd   :  { %p82_p7 = pnand %p81_p6, %p75_p3 }
   0xf   :  { %85 = shalt.err (!%p82_p7)
}
  0x10   :  { %18 = dma.hbm_to_vmem [thread:$0]  %s157_s0, 64, %s16_s10, [#allocation3]  }
  0x11   :  { %108 = dma.done.wait [#allocation3], 64  }
  0x12   :  { %109 = vsyncadd [#allocation3], 4294967232  ;;  %v27_v0 = vlaneseq  ;;  %v113_v1 = vmov 1983009808   ;;  %v25_v7 = vld [vmem:[%s158_s1] sm:$0x3] }
  0x13   :  { %v37_v2 = vunpack.c.l.s4 %v113_v1  ;;  %v24_v12 = vld [vmem:[#allocation2] sm:$0xf]  ;;  %s114_s23 = smov [#allocation5]  }
  0x14   :  { %v28_v3 = vshrl.u32 %v27_v0, 7  ;;  %s52_s0 = sshll.u32 %s114_s23, 4  ;;  %s53_s0 = int_to_ptr.vmem [resolvable:$true] %s52_s0 }
  0x15   :  { %v38_v6 = vunpack.c.0.s8 %v37_v2  ;;  %s86_s24 = scalar_lea.vmem %s53_s0, 64  ;;  %p91_p9 = scmp.lt.s32.totalorder %s53_s0, %s53_s0 }
  0x16   :  { %v29_v4 = vsub.s32 0, %v28_v3  ;;  %v33_v5 = vsub.s32 1, %v28_v3  ;;  %p87_p8 = scmp.ne.s32.totalorder %s53_s0, %s86_s24  ;;  %p92_p10 = scmp.lt.s32.totalorder %s86_s24, %s86_s24 }
  0x17   :  { %v41_v10 = vsub.s32 %v38_v6, %v28_v3 }
  0x18   :  { %v30_v8 = vrot.slane %v25_v7, %v29_v4  ;;  %v34_v9 = vrot.slane %v25_v7, %v33_v5  ;;  %p93_p11 = por %p92_p10, %p91_p9 }
  0x1a   :  { %v35_v11 = vcombine.low %v30_v8, %v34_v9  ;;  %p94_p12 = pnand %p93_p11, %p87_p8 }
  0x1c   :  { %v42_v13 = vrot.slane %v35_v11, %v41_v10 }
  0x1e   :  { %v44_v14 = vadd.f32 %v42_v13, %v24_v12 }
  0x20   :  { %45 = vst [vmem:[#allocation5] sm:$0xf] %v44_v14 }
  0x21   :  { %97 = shalt.err (!%p94_p12)
}
  0x22   :  { %s98_s26 = scalar_lea.hbm %s159_s2, 64 }
  0x23   :  { %p99_p13 = scmp.ne.s32.totalorder %s159_s2, %s98_s26  ;;  %p102_p0 = scmp.lt.u32.totalorder %s98_s26, %s159_s2 }
  0x25   :  { %p104_p1 = pnand %p102_p0, %p99_p13 }
  0x27   :  { %107 = shalt.err (!%p104_p1)
}
  0x28   :  { %55 = dma.vmem_to_hbm [thread:$0]  %s53_s0, 64, %s159_s2, [#allocation4]  }
  0x29   :  { %110 = dma.done.wait [#allocation4], 64  }
  0x2a   :  { %111 = vsyncadd [#allocation4], 4294967232 }
  0x2b   :  { %59 = vsyncpa [#allocation3], 1 }
  0x2c   :  { %60 = vsyncpa [#allocation4], 1 }

</bundles_post_ra>
